<compile_context>
chip_gen: v7x
topology: tpu7x:2x2x1
jax: 0.10.0
libtpu: 0.0.40
codegen_flags: <defaults>
</compile_context>

<pallas_src>
import jax
import jax.numpy as jnp
import numpy as np
from jax.experimental import pallas as pl
from jax.experimental.pallas import tpu as pltpu


# ----------------------------- kernel body --------------------------------

def silu_kernel(x_ref, o_ref):
    # Live path only: out = x * sigmoid(x).  Pure VPU/EUP elementwise stream.
    x = x_ref[...]
    o_ref[...] = x * jax.nn.sigmoid(x)


# ------------------------------ wrapper ------------------------------------

_LANES = 512          # lane-dense last dim: large multiple of 128
_MAX_BLOCK_ROWS = 256  # 256 x 512 f32 tile = 512 KiB; (in+out) double-buffered ~2 MiB


def arm_forward(x, conv_w=None, conv_b=None, bn_gamma=None, bn_beta=None):
    """x: (N, C, H, W) float32.  Returns x * sigmoid(x), same shape.

    conv/bn parameters are accepted for interface fidelity with the PyTorch
    module but are unused: their outputs are dead code in the original
    forward (each `y` assignment overwrites the previous one).
    """
    del conv_w, conv_b, bn_gamma, bn_beta  # dead in the original module

    orig_shape = x.shape
    total = int(np.prod(orig_shape))

    # Flatten to a lane-dense 2D slab: (rows, _LANES), rows padded so the
    # block tiling divides evenly and the last two block dims satisfy (8,128).
    rows = pl.cdiv(total, _LANES)
    block_rows = _MAX_BLOCK_ROWS if rows >= _MAX_BLOCK_ROWS else pl.cdiv(rows, 8) * 8
    padded_rows = pl.cdiv(rows, block_rows) * block_rows
    padded_total = padded_rows * _LANES

    x_flat = x.reshape(-1)
    if padded_total != total:
        x_flat = jnp.pad(x_flat, (0, padded_total - total))
    x2d = x_flat.reshape(padded_rows, _LANES)

    grid = (padded_rows // block_rows,)

    out2d = pl.pallas_call(
        silu_kernel,
        out_shape=jax.ShapeDtypeStruct((padded_rows, _LANES), x.dtype),
        grid_spec=pltpu.PrefetchScalarGridSpec(
            num_scalar_prefetch=0,
            grid=grid,
            in_specs=[pl.BlockSpec((block_rows, _LANES), lambda i: (i, 0))],
            out_specs=pl.BlockSpec((block_rows, _LANES), lambda i: (i, 0)),
        ),
        compiler_params=pltpu.CompilerParams(
            dimension_semantics=("parallel",),
        ),
    )(x2d)

    return out2d.reshape(-1)[:total].reshape(orig_shape)


# ------------------------------- test --------------------------------------

if __name__ == "__main__":
    # in_channels must equal out_channels for the (dead) BatchNorm2d(x) line
    # to be shape-valid in the original PyTorch module.
    N, C, H, W = 2, 4, 16, 16
    in_channels = out_channels = C

    key = jax.random.PRNGKey(0)
    kx, kw, kb = jax.random.split(key, 3)

    x = jax.random.normal(kx, (N, C, H, W), dtype=jnp.float32)

    # Parameters exist on the module but are dead in forward(); kept here for
    # interface fidelity only.
    conv_w = jax.random.normal(kw, (out_channels, in_channels, 1, 1),
                               dtype=jnp.float32) * 0.1
    conv_b = jax.random.normal(kb, (out_channels,), dtype=jnp.float32) * 0.1
    bn_gamma = jnp.ones((out_channels,), dtype=jnp.float32)
    bn_beta = jnp.zeros((out_channels,), dtype=jnp.float32)

    out = arm_forward(x, conv_w, conv_b, bn_gamma, bn_beta)
    out = jax.block_until_ready(out)

    ref = x * jax.nn.sigmoid(x)
    np.testing.assert_allclose(np.asarray(out), np.asarray(ref),
                               rtol=1e-5, atol=1e-5)
    print("KERNEL_OK")
</pallas_src>

<mosaic_0001>
module attributes {stable_mosaic.version = 11 : i64} {
  func.func @silu_kernel(%arg0: i32, %arg1: memref<8x512xf32, #tpu.memory_space<vmem>>, %arg2: memref<8x512xf32, #tpu.memory_space<vmem>>) attributes {dimension_semantics = [#tpu.dimension_semantics<parallel>], iteration_bounds = array<i64: 1>, scalar_prefetch = 0 : i64, scratch_operands = 0 : i64, tpu.core_type = #tpu.core_type<tc>, window_params = [{transform_indices = @transform_0, window_bounds = array<i64: 8, 512>}, {transform_indices = @transform_1, window_bounds = array<i64: 8, 512>}]} {
    %c0 = arith.constant 0 : index
    %c0_0 = arith.constant 0 : index
    %0 = vector.load %arg1[%c0, %c0_0] : memref<8x512xf32, #tpu.memory_space<vmem>>, vector<8x512xf32>
    %1 = arith.negf %0 : vector<8x512xf32>
    %2 = math.exp %1 : vector<8x512xf32>
    %cst = arith.constant 1.000000e+00 : f32
    %3 = vector.broadcast %cst : f32 to vector<8x512xf32>
    %4 = arith.addf %3, %2 : vector<8x512xf32>
    %5 = arith.divf %3, %4 : vector<8x512xf32>
    %6 = arith.mulf %0, %5 : vector<8x512xf32>
    %c0_1 = arith.constant 0 : index
    %c0_2 = arith.constant 0 : index
    %7 = vector.load %arg2[%c0_1, %c0_2] : memref<8x512xf32, #tpu.memory_space<vmem>>, vector<8x512xf32>
    tpu.vector_store %arg2[%c0_1, %c0_2], %6 {strides = array<i32>} : memref<8x512xf32, #tpu.memory_space<vmem>>, vector<8x512xf32>,
    return
  }
  func.func @transform_0(%arg0: i32) -> (i32, i32) {
    %c0_i32 = arith.constant 0 : i32
    %c0_i32_0 = arith.constant 0 : i32
    return %arg0, %c0_i32 : i32, i32
  }
  func.func @transform_1(%arg0: i32) -> (i32, i32) {
    %c0_i32 = arith.constant 0 : i32
    %c0_i32_0 = arith.constant 0 : i32
    return %arg0, %c0_i32 : i32, i32
  }
}

</mosaic_0001>

<bundles_post_ra>
// kernel: tpu_custom_call.1
= control target key start
LH: loop header
LB: loop body
LE: loop exit
PB: predicated region body
PF: predicated region fallthrough
CT: control target
= control target key end

     0   :  { %6 = vsyncpa [#allocation3], 0  ;;  %s178_s0 = inlined_call_operand.hbm [shape: f32[8,512], index: 0, kind: input, shape index: {}]   ;;  %s179_s1 = inlined_call_operand.hbm [shape: f32[8,512], index: 1, kind: output, shape index: {}]  }
   0x1   :  { %7 = vsyncpa [#allocation4], 0  ;;  %s142_s6 = smov [#allocation2]   ;;  %s94_s10 = scalar_lea.hbm %s178_s0, 512 }
   0x2   :  { %s14_s7 = sshll.u32 %s142_s6, 4  ;;  %p95_p0 = scmp.ne.s32.totalorder %s178_s0, %s94_s10  ;;  %s15_s7 = int_to_ptr.vmem [resolvable:$true] %s14_s7 }
   0x3   :  { %p98_p1 = scmp.lt.u32.totalorder %s94_s10, %s178_s0 }
   0x5   :  { %p100_p2 = pnand %p98_p1, %p95_p0 }
   0x7   :  { %103 = shalt.err (!%p100_p2)
}
   0x8   :  { %s104_s15 = scalar_lea.vmem %s15_s7, 512  ;;  %p109_p4 = scmp.lt.s32.totalorder %s15_s7, %s15_s7 }
   0x9   :  { %p105_p3 = scmp.ne.s32.totalorder %s15_s7, %s104_s15  ;;  %p110_p5 = scmp.lt.s32.totalorder %s104_s15, %s104_s15 }
   0xb   :  { %p111_p6 = por %p110_p5, %p109_p4 }
   0xd   :  { %p112_p7 = pnand %p111_p6, %p105_p3 }
   0xf   :  { %115 = shalt.err (!%p112_p7)
}
  0x10   :  { %17 = dma.hbm_to_vmem [thread:$0]  %s178_s0, 512, %s15_s7, [#allocation3]  }
  0x11   :  { %138 = dma.done.wait [#allocation3], 512  }
  0x12   :  { %139 = vsyncadd [#allocation3], 4294966784  ;;  %v21_v0 = vld [vmem:[#allocation2] sm:$0xff]  ;;  %v22_v1 = vld [vmem:[#allocation2 + $0x8] sm:$0xff]  ;;  %s143_s0 = smov [#allocation5]  }
  0x13   :  { %v23_v2 = vld [vmem:[#allocation2 + $0x10] sm:$0xff]  ;;  %v72_v3 = vmul.f32 -1.442695, %v21_v0  ;;  %v73_v4 = vmul.f32 -1.442695, %v22_v1  ;;  %v24_v6 = vld [vmem:[#allocation2 + $0x18] sm:$0xff] }
  0x14   :  { %v74_v5 = vmul.f32 -1.442695, %v23_v2  ;;  %v75_v7 = vmul.f32 -1.442695, %v24_v6  ;;  %s63_s18 = sshll.u32 %s143_s0, 4  ;;  %s64_s18 = int_to_ptr.vmem [resolvable:$true] %s63_s18 }
  0x15   :  { %78 = vpow2.f32 %v72_v3  ;;  %s116_s19 = scalar_lea.vmem %s64_s18, 512  ;;  %p121_p9 = scmp.lt.s32.totalorder %s64_s18, %s64_s18 }
  0x16   :  { %80 = vpow2.f32 %v73_v4  ;;  %p117_p8 = scmp.ne.s32.totalorder %s64_s18, %s116_s19  ;;  %p122_p10 = scmp.lt.s32.totalorder %s116_s19, %s116_s19 }
  0x17   :  { %82 = vpow2.f32 %v74_v5 }
  0x18   :  { %84 = vpow2.f32 %v75_v7  ;;  %p123_p11 = por %p122_p10, %p121_p9 }
  0x1a   :  { %p124_p12 = pnand %p123_p11, %p117_p8 }
  0x1f   :  { %v79_v8 = vpop.eup %78 }
  0x20   :  { %v81_v9 = vpop.eup %80  ;;  %v37_v10 = vadd.f32 1.0, %v79_v8 }
  0x21   :  { %v83_v11 = vpop.eup %82  ;;  %v38_v12 = vadd.f32 1.0, %v81_v9 }
  0x22   :  { %v85_v13 = vpop.eup %84  ;;  %86 = vrcp.f32 %v37_v10  ;;  %v39_v14 = vadd.f32 1.0, %v83_v11 }
  0x23   :  { %88 = vrcp.f32 %v38_v12  ;;  %v40_v15 = vadd.f32 1.0, %v85_v13 }
  0x24   :  { %90 = vrcp.f32 %v39_v14 }
  0x25   :  { %92 = vrcp.f32 %v40_v15 }
  0x2c   :  { %v87_v16 = vpop.eup %86 }
  0x2d   :  { %v89_v17 = vpop.eup %88  ;;  %v49_v18 = vmul.f32 %v87_v16, %v21_v0 }
  0x2e   :  { %v91_v19 = vpop.eup %90  ;;  %v50_v20 = vmul.f32 %v89_v17, %v22_v1 }
  0x2f   :  { %v93_v21 = vpop.eup %92  ;;  %53 = vst [vmem:[#allocation5] sm:$0xff] %v49_v18  ;;  %v51_v22 = vmul.f32 %v91_v19, %v23_v2 }
  0x30   :  { %54 = vst [vmem:[#allocation5 + $0x8] sm:$0xff] %v50_v20  ;;  %v52_v23 = vmul.f32 %v93_v21, %v24_v6 }
  0x31   :  { %55 = vst [vmem:[#allocation5 + $0x10] sm:$0xff] %v51_v22 }
  0x32   :  { %56 = vst [vmem:[#allocation5 + $0x18] sm:$0xff] %v52_v23 }
  0x33   :  { %127 = shalt.err (!%p124_p12)
}
  0x34   :  { %s128_s22 = scalar_lea.hbm %s179_s1, 512 }
  0x35   :  { %p129_p13 = scmp.ne.s32.totalorder %s179_s1, %s128_s22  ;;  %p132_p0 = scmp.lt.u32.totalorder %s128_s22, %s179_s1 }
  0x37   :  { %p134_p1 = pnand %p132_p0, %p129_p13 }
  0x39   :  { %137 = shalt.err (!%p134_p1)
}
  0x3a   :  { %66 = dma.vmem_to_hbm [thread:$0]  %s64_s18, 512, %s179_s1, [#allocation4]  }
  0x3b   :  { %140 = dma.done.wait [#allocation4], 512  }
  0x3c   :  { %141 = vsyncadd [#allocation4], 4294966784 }
  0x3d   :  { %70 = vsyncpa [#allocation3], 1 }
  0x3e   :  { %71 = vsyncpa [#allocation4], 1 }

</bundles_post_ra>
